<compile_context>
chip_gen: v7x
topology: tpu7x:2x2x1
jax: 0.10.0
libtpu: 0.0.40
codegen_flags: <defaults>
</compile_context>

<pallas_src>
import jax
import jax.numpy as jnp
from jax.experimental import pallas as pl
from jax.experimental.pallas import tpu as pltpu


def _loss_score_kernel(edge_ref, cls_ref, tgt_ref, out_ref):
    # edge_ref: (TB, 2N) f32 -- [:, :N] sub-edge scores, [:, N:] obj-edge scores
    # cls_ref : (TB, N)  i32 -- class id per object
    # tgt_ref : (TB, S)  i32 -- ids present in the target sentence (-1 pad)
    # out_ref : (1, 1)   f32 -- per-block partial sum (un-normalized)
    TB, N = cls_ref.shape

    edge = edge_ref[...]                                     # (TB, 2N)
    # x -> x + (x == 0): zero entries become 1 so log() gives exactly 0.
    safe = edge + (edge == 0.0).astype(jnp.float32)          # full-width VPU

    # Fused single log: -log(a') - log(b') == -log(a' * b').  One EUP pass
    # over N lanes instead of two over 2N.  (Denormal-small products could
    # underflow to 0 -> inf; edge scores live in [0, 1], so this is benign.)
    score = -jnp.log(safe[:, :N] * safe[:, N:])              # (TB, N)

    # Membership test, kept in packed bool: unrolled compare/OR over the S
    # sentence slots; live intermediates stay at one (TB, N) tile.
    cls = cls_ref[...]                                       # (TB, N)
    tgt = tgt_ref[...]                                       # (TB, S)
    S = tgt.shape[1]
    name_b = cls == tgt[:, 0:1]
    for s in range(1, S):
        name_b = jnp.logical_or(name_b, cls == tgt[:, s:s + 1])
    # Guard: a padded/invalid object (id < 0) must never match the -1
    # sentence padding.  No-op for the contract's class ids (>= 0).
    name_b = jnp.logical_and(name_b, cls >= 0)
    name = name_b.astype(jnp.float32)                        # single i1->f32 cast

    # Lane mask replaces the reference's `[:, 2:]` slices.  Select on the
    # product (not on `name`): lanes >= 2 keep exact NaN-propagation
    # semantics, lanes 0,1 are fully excluded (any garbage there never
    # reaches the sum -- lax.select does not propagate from the unselected
    # branch).
    lane = jax.lax.broadcasted_iota(jnp.int32, (TB, N), 1)
    contrib = jnp.where(lane >= 2, score * name, 0.0)        # (TB, N)

    out_ref[...] = jnp.sum(contrib, keepdims=True)           # (1, 1)


def loss_score(output, adjacency_matrix, class_ids, target_ids):
    """Pallas equivalent of Loss_score.forward.

    output:           (B, 2, N) float edge scores for the sub/obj rows
    adjacency_matrix: unused (only its .device is used in the reference)
    class_ids:        (B, N) int32 class id per object (>= 0)
    target_ids:       (B, S) int32 ids in the target sentence (-1 padding)
    """
    del adjacency_matrix
    B, two, N = output.shape
    assert two == 2
    S = target_ids.shape[1]

    # Cast only when needed -- avoid extra HLO around a launch-bound call.
    if output.dtype != jnp.float32:
        output = output.astype(jnp.float32)
    if class_ids.dtype != jnp.int32:
        class_ids = class_ids.astype(jnp.int32)
    if target_ids.dtype != jnp.int32:
        target_ids = target_ids.astype(jnp.int32)

    # Free contiguous view (no HBM transpose pass): (B, 2, N) -> (B, 2N).
    edges = output.reshape(B, 2 * N)

    # Batch tile: whole batch at small B; 8-sublane multiples otherwise.
    # Blocks always divide B exactly (no out-of-bounds padding rows).
    if B <= 8 or B % 8 != 0:
        TB = B
    else:
        TB = 8
    nb = B // TB

    cost = pl.CostEstimate(
        flops=10 * B * N + 2 * B * N * S,
        transcendentals=B * N,                    # one fused log per (b, n)
        bytes_accessed=(edges.size + class_ids.size + target_ids.size + nb) * 4,
    )

    partials = pl.pallas_call(
        _loss_score_kernel,
        out_shape=jax.ShapeDtypeStruct((nb, 1), jnp.float32),
        grid=(nb,),
        in_specs=[
            pl.BlockSpec((TB, 2 * N), lambda i: (i, 0)),
            pl.BlockSpec((TB, N), lambda i: (i, 0)),
            pl.BlockSpec((TB, S), lambda i: (i, 0)),
        ],
        out_specs=pl.BlockSpec((1, 1), lambda i: (i, 0)),
        compiler_params=pltpu.CompilerParams(
            dimension_semantics=("parallel",)),
        cost_estimate=cost,
    )(edges, class_ids, target_ids)

    # Finish the reduction + normalization in the wrapper (exact /B, as in
    # the reference).
    return jnp.sum(partials) / B


def _loss_score_ref(output, class_ids, target_ids):
    """Pure-JAX reference for verification (mirrors the PyTorch module)."""
    B = output.shape[0]
    score = output[:, :, 2:]
    zero_mask = (score == 0.0).astype(jnp.float32)
    score = -jnp.log(score + zero_mask)
    score = jnp.sum(score, axis=1)
    cls_tail = class_ids[:, 2:]
    name_matrix = jnp.any(
        cls_tail[:, :, None] == target_ids[:, None, :], axis=-1
    ).astype(jnp.float32)
    return jnp.sum(score * name_matrix) / B


if __name__ == "__main__":
    key = jax.random.PRNGKey(0)
    B, N, S = 2, 16, 8
    NUM_CLASSES = 20

    k_out, k_zero, k_cls, k_tgt = jax.random.split(key, 4)

    # Edge scores in (0, 1), with some entries exactly zero (masked edges).
    output = jax.random.uniform(k_out, (B, 2, N), dtype=jnp.float32,
                                minval=0.05, maxval=1.0)
    zero_sel = jax.random.bernoulli(k_zero, 0.25, (B, 2, N))
    output = jnp.where(zero_sel, 0.0, output)

    # Adjacency matrix (unused in the math, kept for signature parity).
    adjacency_matrix = jnp.ones((B, N, N), dtype=jnp.float32)

    # Object class ids (>= 0) and target-sentence ids with -1 padding.
    class_ids = jax.random.randint(k_cls, (B, N), 0, NUM_CLASSES, dtype=jnp.int32)
    target_ids = jax.random.randint(k_tgt, (B, S), 0, NUM_CLASSES, dtype=jnp.int32)
    target_ids = target_ids.at[:, -2:].set(-1)             # padding slots
    target_ids = target_ids.at[:, 0].set(class_ids[:, 3])  # guarantee a hit

    loss = loss_score(output, adjacency_matrix, class_ids, target_ids)
    jax.block_until_ready(loss)

    ref = _loss_score_ref(output, class_ids, target_ids)
    assert jnp.allclose(loss, ref, rtol=1e-5, atol=1e-5), (loss, ref)

    print("KERNEL_OK")
</pallas_src>

<mosaic_0001>
module attributes {stable_mosaic.version = 11 : i64} {
  func.func @_loss_score_kernel(%arg0: i32, %arg1: memref<2x32xf32, #tpu.memory_space<vmem>>, %arg2: memref<2x16xi32, #tpu.memory_space<vmem>>, %arg3: memref<2x8xi32, #tpu.memory_space<vmem>>, %arg4: memref<1x1xf32, #tpu.memory_space<vmem>>) attributes {dimension_semantics = [#tpu.dimension_semantics<parallel>], iteration_bounds = array<i64: 1>, scalar_prefetch = 0 : i64, scratch_operands = 0 : i64, tpu.core_type = #tpu.core_type<tc>, window_params = [{transform_indices = @transform_0, window_bounds = array<i64: 2, 32>}, {transform_indices = @transform_1, window_bounds = array<i64: 2, 16>}, {transform_indices = @transform_2, window_bounds = array<i64: 2, 8>}, {transform_indices = @transform_3, window_bounds = array<i64: 1, 1>}]} {
    %c0 = arith.constant 0 : index
    %c0_0 = arith.constant 0 : index
    %0 = vector.load %arg1[%c0, %c0_0] : memref<2x32xf32, #tpu.memory_space<vmem>>, vector<2x32xf32>
    %cst = arith.constant 0.000000e+00 : f32
    %1 = vector.broadcast %cst : f32 to vector<2x32xf32>
    %2 = arith.cmpf oeq, %0, %1 : vector<2x32xf32>
    %3 = arith.extui %2 : vector<2x32xi1> to vector<2x32xi32>
    %4 = arith.sitofp %3 : vector<2x32xi32> to vector<2x32xf32>
    %5 = arith.addf %0, %4 : vector<2x32xf32>
    %6 = vector.extract_strided_slice %5 {offsets = [0, 0], sizes = [2, 16], strides = [1, 1]} : vector<2x32xf32> to vector<2x16xf32>
    %7 = vector.extract_strided_slice %5 {offsets = [0, 16], sizes = [2, 16], strides = [1, 1]} : vector<2x32xf32> to vector<2x16xf32>
    %8 = arith.mulf %6, %7 : vector<2x16xf32>
    %9 = math.log %8 : vector<2x16xf32>
    %cst_1 = arith.constant 0.000000e+00 : f32
    %10 = vector.broadcast %cst_1 : f32 to vector<2x16xf32>
    %11 = arith.subf %10, %9 : vector<2x16xf32>
    %c0_2 = arith.constant 0 : index
    %c0_3 = arith.constant 0 : index
    %12 = vector.load %arg2[%c0_2, %c0_3] : memref<2x16xi32, #tpu.memory_space<vmem>>, vector<2x16xi32>
    %c0_4 = arith.constant 0 : index
    %c0_5 = arith.constant 0 : index
    %13 = vector.load %arg3[%c0_4, %c0_5] : memref<2x8xi32, #tpu.memory_space<vmem>>, vector<2x8xi32>
    %14 = vector.extract_strided_slice %13 {offsets = [0, 0], sizes = [2, 1], strides = [1, 1]} : vector<2x8xi32> to vector<2x1xi32>
    %15 = vector.broadcast %14 : vector<2x1xi32> to vector<2x16xi32>
    %16 = arith.cmpi eq, %12, %15 : vector<2x16xi32>
    %17 = vector.extract_strided_slice %13 {offsets = [0, 1], sizes = [2, 1], strides = [1, 1]} : vector<2x8xi32> to vector<2x1xi32>
    %18 = vector.broadcast %17 : vector<2x1xi32> to vector<2x16xi32>
    %19 = arith.cmpi eq, %12, %18 : vector<2x16xi32>
    %20 = arith.ori %16, %19 : vector<2x16xi1>
    %21 = vector.extract_strided_slice %13 {offsets = [0, 2], sizes = [2, 1], strides = [1, 1]} : vector<2x8xi32> to vector<2x1xi32>
    %22 = vector.broadcast %21 : vector<2x1xi32> to vector<2x16xi32>
    %23 = arith.cmpi eq, %12, %22 : vector<2x16xi32>
    %24 = arith.ori %20, %23 : vector<2x16xi1>
    %25 = vector.extract_strided_slice %13 {offsets = [0, 3], sizes = [2, 1], strides = [1, 1]} : vector<2x8xi32> to vector<2x1xi32>
    %26 = vector.broadcast %25 : vector<2x1xi32> to vector<2x16xi32>
    %27 = arith.cmpi eq, %12, %26 : vector<2x16xi32>
    %28 = arith.ori %24, %27 : vector<2x16xi1>
    %29 = vector.extract_strided_slice %13 {offsets = [0, 4], sizes = [2, 1], strides = [1, 1]} : vector<2x8xi32> to vector<2x1xi32>
    %30 = vector.broadcast %29 : vector<2x1xi32> to vector<2x16xi32>
    %31 = arith.cmpi eq, %12, %30 : vector<2x16xi32>
    %32 = arith.ori %28, %31 : vector<2x16xi1>
    %33 = vector.extract_strided_slice %13 {offsets = [0, 5], sizes = [2, 1], strides = [1, 1]} : vector<2x8xi32> to vector<2x1xi32>
    %34 = vector.broadcast %33 : vector<2x1xi32> to vector<2x16xi32>
    %35 = arith.cmpi eq, %12, %34 : vector<2x16xi32>
    %36 = arith.ori %32, %35 : vector<2x16xi1>
    %37 = vector.extract_strided_slice %13 {offsets = [0, 6], sizes = [2, 1], strides = [1, 1]} : vector<2x8xi32> to vector<2x1xi32>
    %38 = vector.broadcast %37 : vector<2x1xi32> to vector<2x16xi32>
    %39 = arith.cmpi eq, %12, %38 : vector<2x16xi32>
    %40 = arith.ori %36, %39 : vector<2x16xi1>
    %41 = vector.extract_strided_slice %13 {offsets = [0, 7], sizes = [2, 1], strides = [1, 1]} : vector<2x8xi32> to vector<2x1xi32>
    %42 = vector.broadcast %41 : vector<2x1xi32> to vector<2x16xi32>
    %43 = arith.cmpi eq, %12, %42 : vector<2x16xi32>
    %44 = arith.ori %40, %43 : vector<2x16xi1>
    %c0_i32 = arith.constant 0 : i32
    %45 = vector.broadcast %c0_i32 : i32 to vector<2x16xi32>
    %46 = arith.cmpi sge, %12, %45 : vector<2x16xi32>
    %47 = arith.andi %44, %46 : vector<2x16xi1>
    %48 = arith.extui %47 : vector<2x16xi1> to vector<2x16xi32>
    %49 = arith.sitofp %48 : vector<2x16xi32> to vector<2x16xf32>
    %50 = tpu.iota {dimensions = array<i32: 1>} : vector<2x16xi32>
    %c2_i32 = arith.constant 2 : i32
    %51 = vector.broadcast %c2_i32 : i32 to vector<2x16xi32>
    %52 = arith.cmpi sge, %50, %51 : vector<2x16xi32>
    %53 = arith.mulf %11, %49 : vector<2x16xf32>
    %cst_6 = arith.constant 0.000000e+00 : f32
    %54 = vector.broadcast %cst_6 : f32 to vector<2x16xf32>
    %55 = arith.select %52, %53, %54 : vector<2x16xi1>, vector<2x16xf32>
    %56 = vector.shape_cast %55 : vector<2x16xf32> to vector<1x2x16xf32>
    %cst_7 = arith.constant dense<0.000000e+00> : vector<1xf32>
    %57 = vector.multi_reduction <add>, %56, %cst_7 [1, 2] : vector<1x2x16xf32> to vector<1xf32>
    %58 = vector.shape_cast %57 : vector<1xf32> to vector<1x1x1xf32>
    %59 = vector.extract %58[0, 0, 0] : f32 from vector<1x1x1xf32>
    %60 = vector.broadcast %59 : f32 to vector<1x1xf32>
    %c0_8 = arith.constant 0 : index
    %c0_9 = arith.constant 0 : index
    %61 = vector.load %arg4[%c0_8, %c0_9] : memref<1x1xf32, #tpu.memory_space<vmem>>, vector<1x1xf32>
    tpu.vector_store %arg4[%c0_8, %c0_9], %60 {strides = array<i32>} : memref<1x1xf32, #tpu.memory_space<vmem>>, vector<1x1xf32>,
    return
  }
  func.func @transform_0(%arg0: i32) -> (i32, i32) {
    %c0_i32 = arith.constant 0 : i32
    %c0_i32_0 = arith.constant 0 : i32
    return %arg0, %c0_i32 : i32, i32
  }
  func.func @transform_1(%arg0: i32) -> (i32, i32) {
    %c0_i32 = arith.constant 0 : i32
    %c0_i32_0 = arith.constant 0 : i32
    return %arg0, %c0_i32 : i32, i32
  }
  func.func @transform_2(%arg0: i32) -> (i32, i32) {
    %c0_i32 = arith.constant 0 : i32
    %c0_i32_0 = arith.constant 0 : i32
    return %arg0, %c0_i32 : i32, i32
  }
  func.func @transform_3(%arg0: i32) -> (i32, i32) {
    %c0_i32 = arith.constant 0 : i32
    %c0_i32_0 = arith.constant 0 : i32
    return %arg0, %c0_i32 : i32, i32
  }
}

</mosaic_0001>

<bundles_post_ra>
// kernel: tpu_custom_call.1
= control target key start
LH: loop header
LB: loop body
LE: loop exit
PB: predicated region body
PF: predicated region fallthrough
CT: control target
= control target key end

     0   :  { %8 = vsyncpa [#allocation3], 0  ;;  %s255_s0 = inlined_call_operand.hbm [shape: f32[2,32], index: 0, kind: input, shape index: {}]   ;;  %s256_s1 = inlined_call_operand.vmem [shape: s32[2,16], index: 1, kind: input, shape index: {}]   ;;  %s257_s2 = inlined_call_operand.vmem [shape: s32[2,8], index: 2, kind: input, shape index: {}]   ;;  %s258_s3 = inlined_call_operand.hbm [shape: f32[1,1], index: 3, kind: output, shape index: {}]  }
   0x1   :  { %9 = vsyncpa [#allocation4], 0  ;;  %s193_s12 = smov [#allocation2]   ;;  %s145_s16 = scalar_lea.hbm %s255_s0, 32 }
   0x2   :  { %s16_s13 = sshll.u32 %s193_s12, 4  ;;  %p146_p0 = scmp.ne.s32.totalorder %s255_s0, %s145_s16  ;;  %s17_s13 = int_to_ptr.vmem [resolvable:$true] %s16_s13 }
   0x3   :  { %p149_p1 = scmp.lt.u32.totalorder %s145_s16, %s255_s0 }
   0x5   :  { %p151_p2 = pnand %p149_p1, %p146_p0 }
   0x7   :  { %154 = shalt.err (!%p151_p2)
}
   0x8   :  { %s155_s21 = scalar_lea.vmem %s17_s13, 32  ;;  %p160_p4 = scmp.lt.s32.totalorder %s17_s13, %s17_s13 }
   0x9   :  { %p156_p3 = scmp.ne.s32.totalorder %s17_s13, %s155_s21  ;;  %p161_p5 = scmp.lt.s32.totalorder %s155_s21, %s155_s21 }
   0xb   :  { %p162_p6 = por %p161_p5, %p160_p4 }
   0xd   :  { %p163_p7 = pnand %p162_p6, %p156_p3 }
   0xf   :  { %166 = shalt.err (!%p163_p7)
}
  0x10   :  { %19 = dma.hbm_to_vmem [thread:$0]  %s255_s0, 32, %s17_s13, [#allocation3]  }
  0x11   :  { %189 = dma.done.wait [#allocation3], 32  }
  0x12   :  { %190 = vsyncadd [#allocation3], 4294967264  ;;  %v194_v0 = vmov 1   ;;  %v195_v1 = vmov 0   ;;  %v41_v2 = vld [vmem:[%s257_s2] sm:$0x3]  ;;  %v85_v24 = vlaneseq }
  0x13   :  { %136 = vset.pattern.permute.xlu1 %v194_v0  ;;  %135 = vset.pattern.permute.xlu0 %v195_v1  ;;  %v27_v3 = vld [vmem:[#allocation2] sm:$0x3]  ;;  %v196_v4 = vmov 0.0   ;;  %v197_v7 = vmov 2   ;;  %s198_s0 = smov 112   ;;  %v199_v8 = vmov 4  }
  0x14   :  { %47 = vperm.xlu1 %136, %v41_v2   ;;  %43 = vperm.xlu0 %135, %v41_v2   ;;  %vm28_vm0 = vcmp.eq.f32.partialorder %v27_v3, 0.0  ;;  %v200_v9 = vmov 3   ;;  %v201_v10 = vmov 7   ;;  %v202_v11 = vmov 5   ;;  %v40_v18 = vld [vmem:[%s256_s1] sm:$0x3] }
  0x15   :  { %v119_v5 = vsel %vm28_vm0, 1.0, %v196_v4  ;;  %v203_v12 = vmov 6   ;;  %vm81_vm14 = vcmp.ge.s32.totalorder %v40_v18, 0  ;;  %v86_v27 = vand.u32 127, %v85_v24  ;;  %s204_s1 = smov [#allocation5]  }
  0x16   :  { %v31_v6 = vadd.f32 %v119_v5, %v27_v3  ;;  %s110_s27 = sshll.u32 %s204_s1, 4  ;;  %s111_s27 = int_to_ptr.vmem [resolvable:$true] %s110_s27 }
  0x17   :  { %s167_s29 = scalar_lea.vmem %s111_s27, 16  ;;  %s171_s30 = scalar_lea.vmem %s111_s27, 32 }
  0x18   :  { %137 = vset.pattern.permute.xlu1 %v197_v7  ;;  %33 = vrot.lane.b32.xlu0 %v31_v6, %s198_s0  ;;  %p168_p8 = scmp.ne.s32.totalorder %s111_s27, %s167_s29  ;;  %p172_p9 = scmp.lt.s32.totalorder %s111_s27, %s111_s27 }
  0x19   :  { %52 = vperm.xlu1 %137, %v41_v2   ;;  %139 = vset.pattern.permute.xlu0 %v199_v8  ;;  %p173_p10 = scmp.lt.s32.totalorder %s171_s30, %s167_s29 }
  0x1b   :  { %p174_p11 = por %p173_p10, %p172_p9 }
  0x1c   :  { %62 = vperm.xlu0 %139, %v41_v2  }
  0x1d   :  { %138 = vset.pattern.permute.xlu1 %v200_v9  ;;  %p175_p12 = pnand %p174_p11, %p168_p8 }
  0x1e   :  { %57 = vperm.xlu1 %138, %v41_v2  }
  0x20   :  { %142 = vset.pattern.permute.xlu0 %v201_v10 }
  0x21   :  { %77 = vperm.xlu0 %142, %v41_v2  }
  0x22   :  { %140 = vset.pattern.permute.xlu1 %v202_v11 }
  0x23   :  { %67 = vperm.xlu1 %140, %v41_v2  }
  0x27   :  { %141 = vset.pattern.permute.xlu1 %v203_v12 }
  0x28   :  { %72 = vperm.xlu1 %141, %v41_v2  }
  0x93   :  { %v48_v13 = vpop.permute.xlu1 %47  ;;  %v44_v14 = vpop.permute.xlu0 %43 }
  0x94   :  { %vm49_vm1 = vcmp.eq.s32.totalorder %v40_v18, %v48_v13  ;;  %vm45_vm2 = vcmp.eq.s32.totalorder %v40_v18, %v44_v14 }
  0x95   :  { %vm50_vm5 = vmor %vm45_vm2, %vm49_vm1  ;;  %vm87_vm2 = vcmp.ge.s32.totalorder %v86_v27, 2 }
  0x97   :  { %v34_v15 = vpop.permute.xlu0 %33 }
  0x98   :  { %v36_v16 = vmul.f32 %v34_v15, %v31_v6  ;;  %v53_v17 = vpop.permute.xlu1 %52 }
  0x99   :  { %vm54_vm3 = vcmp.eq.s32.totalorder %v40_v18, %v53_v17 }
  0x9a   :  { %143 = vlog2.f32 %v36_v16  ;;  %vm55_vm6 = vmor %vm50_vm5, %vm54_vm3  ;;  %vm90_vm3 = vcmask 123904  }
  0x9b   :  { %v63_v20 = vpop.permute.xlu0 %62 }
  0x9c   :  { %vm64_vm8 = vcmp.eq.s32.totalorder %v40_v18, %v63_v20 }
  0x9d   :  { %v58_v19 = vpop.permute.xlu1 %57 }
  0x9e   :  { %vm59_vm4 = vcmp.eq.s32.totalorder %v40_v18, %v58_v19 }
  0x9f   :  { %vm60_vm7 = vmor %vm55_vm6, %vm59_vm4  ;;  %vm102_vm4 = vcmask 0  }
  0xa0   :  { %v78_v23 = vpop.permute.xlu0 %77  ;;  %vm65_vm10 = vmor %vm60_vm7, %vm64_vm8 }
  0xa1   :  { %vm79_vm11 = vcmp.eq.s32.totalorder %v40_v18, %v78_v23 }
  0xa2   :  { %v68_v21 = vpop.permute.xlu1 %67 }
  0xa3   :  { %vm69_vm9 = vcmp.eq.s32.totalorder %v40_v18, %v68_v21 }
  0xa4   :  { %v144_v22 = vpop.eup %143  ;;  %vm70_vm12 = vmor %vm65_vm10, %vm69_vm9 }
  0xa5   :  { %v38_v25 = vmul.f32 0.6931472, %v144_v22 }
  0xa7   :  { %v73_v26 = vpop.permute.xlu1 %72  ;;  %v39_v28 = vsub.f32 0.0, %v38_v25 }
  0xa8   :  { %vm74_vm13 = vcmp.eq.s32.totalorder %v40_v18, %v73_v26 }
  0xa9   :  { %vm75_vm15 = vmor %vm70_vm12, %vm74_vm13 }
  0xaa   :  { %vm80_vm0 = vmor %vm75_vm15, %vm79_vm11 }
  0xab   :  { %vm82_vm1 = vmand %vm80_vm0, %vm81_vm14 }
  0xac   :  { %v120_v29 = vsel %vm82_vm1, 1.0, %v196_v4 }
  0xad   :  { %v88_v30 = vmul.f32 %v120_v29, %v39_v28 }
  0xaf   :  { %v89_v31 = vsel %vm87_vm2, %v88_v30, 0.0 }
  0xb0   :  { %v91_v32 = vsel %vm90_vm3, %v89_v31, 0.0 }
  0xb1   :  { %92 = vadd.xlane.f32.xlu1 %v91_v32 }
 0x13e   :  { %v93_v33 = vpop.xlane.xlu1 %92 }
 0x13f   :  { %v94_v34 = vrot.slane %v93_v33, 4 }
 0x141   :  { %v95_v35 = vadd.f32 %v94_v34, %v93_v33 }
 0x143   :  { %v96_v36 = vrot.slane %v95_v35, 2 }
 0x145   :  { %v97_v37 = vadd.f32 %v96_v36, %v95_v35 }
 0x147   :  { %v98_v38 = vrot.slane %v97_v37, 1 }
 0x149   :  { %v99_v39 = vadd.f32 %v98_v38, %v97_v37 }
 0x14b   :  { %121 = vpush %v99_v39 }
 0x17c   :  { %s122_s28 = spop %121 }
 0x17d   :  { %v101_v40 = vstv %s122_s28 }
 0x17e   :  { %103 = vst.msk [vmem:[#allocation5] sm:$0x1] %vm102_vm4, %v101_v40 }
 0x17f   :  { %178 = shalt.err (!%p175_p12)
}
 0x180   :  { %s179_s6 = scalar_lea.hbm %s258_s3, 16 }
 0x181   :  { %p180_p13 = scmp.ne.s32.totalorder %s258_s3, %s179_s6  ;;  %p183_p0 = scmp.lt.u32.totalorder %s179_s6, %s258_s3 }
 0x183   :  { %p185_p1 = pnand %p183_p0, %p180_p13 }
 0x185   :  { %188 = shalt.err (!%p185_p1)
}
 0x186   :  { %113 = dma.vmem_to_hbm [thread:$0]  %s111_s27, 16, %s258_s3, [#allocation4]  }
 0x187   :  { %191 = dma.done.wait [#allocation4], 16  }
 0x188   :  { %192 = vsyncadd [#allocation4], 4294967280 }
 0x189   :  { %117 = vsyncpa [#allocation3], 1 }
 0x18a   :  { %118 = vsyncpa [#allocation4], 1 }

</bundles_post_ra>
